<compile_context>
chip_gen: v7x
topology: tpu7x:2x2x1
jax: 0.10.0
libtpu: 0.0.40
codegen_flags: <defaults>
</compile_context>

<pallas_src>
import functools

import jax
import jax.numpy as jnp
import numpy as np
from jax.experimental import pallas as pl
from jax.experimental.pallas import tpu as pltpu


def _round_up(x, m):
    return ((x + m - 1) // m) * m


def _choose_tiles(n_rows, n_cols, itemsize, target_bytes=4 << 20):
    """Byte-budget tile selection (~target_bytes per input per grid step)."""
    sub = {4: 8, 2: 16, 1: 32}.get(itemsize, 8)
    budget = max(target_bytes // itemsize, sub * 128)        # elements per tile
    c128 = _round_up(n_cols, 128)
    if c128 * sub <= budget:
        tile_c = n_cols                                      # whole row -> no column mask
        rows = budget // max(n_cols, 1)
        if rows >= n_rows:
            tile_r = n_rows                                  # single row tile -> no row mask
        else:
            tile_r = max((rows // sub) * sub, sub)
    else:
        tile_c = max(((budget // sub) // 128) * 128, 128)    # wide, lane-aligned tiles
        tile_c = min(tile_c, c128)
        tile_r = sub
    return tile_r, tile_c


def _std_partial_kernel(
    lt_ref, ls_ref,                       # (tile_r, tile_c) logit blocks (native dtype)
    out_t_ref, out_s_ref,                 # (1, 1, 1) per-row-tile partial std sums (f32)
    sum_t, sq_t, sh_t, sum_s, sq_s, sh_s,  # (tile_r, 1) f32 scratch
    *, n_rows, n_cols, tile_r, tile_c, mask_rows, mask_cols):
    r = pl.program_id(0)          # row-tile index ("parallel")
    c = pl.program_id(1)          # class-tile index (reduction axis, innermost)
    nc = pl.num_programs(1)

    xt = lt_ref[...].astype(jnp.float32)   # per-tile upcast (bf16 -> f32)
    xs = ls_ref[...].astype(jnp.float32)

    @pl.when(c == 0)
    def _init_row_tile():
        # Per-row shift (first class of each row) stabilizes sumsq - sum^2/C
        # against cancellation when logits carry a large common offset.
        sh_t[...] = xt[:, 0:1]
        sh_s[...] = xs[:, 0:1]
        sum_t[...] = jnp.zeros_like(sum_t)
        sq_t[...] = jnp.zeros_like(sq_t)
        sum_s[...] = jnp.zeros_like(sum_s)
        sq_s[...] = jnp.zeros_like(sq_s)

    dt = xt - sh_t[...]
    ds = xs - sh_s[...]
    if mask_cols:  # static flag: compiled in only when the class dim is ragged
        col = c * tile_c + jax.lax.broadcasted_iota(jnp.int32, dt.shape, 1)
        valid = col < n_cols
        dt = jnp.where(valid, dt, 0.0)     # select (not multiply): OOB may be NaN/inf
        ds = jnp.where(valid, ds, 0.0)

    # Row reductions on the otherwise-idle MXU: frees the binding VALU slot.
    ones = jnp.ones((tile_c, 1), jnp.float32)
    sum_t[...] += jnp.dot(dt, ones, preferred_element_type=jnp.float32)
    sq_t[...] += jnp.dot(dt * dt, ones, preferred_element_type=jnp.float32)
    sum_s[...] += jnp.dot(ds, ones, preferred_element_type=jnp.float32)
    sq_s[...] += jnp.dot(ds * ds, ones, preferred_element_type=jnp.float32)

    @pl.when(c == nc - 1)
    def _finish_row_tile():
        inv_c = 1.0 / n_cols
        inv_cm1 = 1.0 / (n_cols - 1)                 # unbiased (ddof=1)
        var_t = (sq_t[...] - sum_t[...] * sum_t[...] * inv_c) * inv_cm1
        var_s = (sq_s[...] - sum_s[...] * sum_s[...] * inv_c) * inv_cm1
        std_t = jnp.sqrt(jnp.maximum(var_t, 0.0))    # (tile_r, 1)
        std_s = jnp.sqrt(jnp.maximum(var_s, 0.0))
        if mask_rows:  # garbage edge rows may be NaN/inf -> must be a select
            row = r * tile_r + jax.lax.broadcasted_iota(jnp.int32, std_t.shape, 0)
            valid_r = row < n_rows
            std_t = jnp.where(valid_r, std_t, 0.0)
            std_s = jnp.where(valid_r, std_s, 0.0)
        out_t_ref[...] = jnp.sum(std_t).reshape(1, 1, 1)
        out_s_ref[...] = jnp.sum(std_s).reshape(1, 1, 1)


def adaptive_temperature(logit_t, logit_s, params, *, tile_r=None, tile_c=None):
    """std(dim=-1).mean() for teacher & student (Pallas) + 2->128->1 MLP (wrapper)."""
    w1_t, b1, w2, b2 = params
    assert logit_t.shape == logit_s.shape, "teacher/student logits must share a shape"
    C = logit_t.shape[-1]
    assert C >= 2, "std(dim=-1, unbiased) needs at least 2 classes"

    lt = logit_t.reshape(-1, C)            # keep native dtype (no f32 HBM copy)
    ls = logit_s.reshape(-1, C)
    R = lt.shape[0]
    itemsize = jnp.dtype(lt.dtype).itemsize
    sub = {4: 8, 2: 16, 1: 32}.get(itemsize, 8)

    auto_r, auto_c = _choose_tiles(R, C, itemsize)
    if tile_r is None:
        tile_r = auto_r
    elif tile_r != R:
        tile_r = _round_up(tile_r, sub)
    if tile_c is None:
        tile_c = auto_c
    elif tile_c != C:
        tile_c = _round_up(tile_c, 128)

    grid_r = pl.cdiv(R, tile_r)
    grid_c = pl.cdiv(C, tile_c)
    mask_rows = (grid_r * tile_r != R)     # ragged edges handled in-kernel (no jnp.pad)
    mask_cols = (grid_c * tile_c != C)

    kernel = functools.partial(
        _std_partial_kernel,
        n_rows=R, n_cols=C, tile_r=tile_r, tile_c=tile_c,
        mask_rows=mask_rows, mask_cols=mask_cols)

    logit_spec = pl.BlockSpec((tile_r, tile_c), lambda r, c: (r, c))
    partial_spec = pl.BlockSpec((1, 1, 1), lambda r, c: (r, 0, 0))

    tile_bytes = tile_r * tile_c * itemsize
    pipeline_bytes = 2 * 2 * tile_bytes    # 2 inputs x double buffering
    vmem_limit = int(min(max(2 * pipeline_bytes + (4 << 20), 32 << 20), 64 << 20))

    sums_t, sums_s = pl.pallas_call(
        kernel,
        out_shape=(jax.ShapeDtypeStruct((grid_r, 1, 1), jnp.float32),
                   jax.ShapeDtypeStruct((grid_r, 1, 1), jnp.float32)),
        grid_spec=pltpu.PrefetchScalarGridSpec(
            num_scalar_prefetch=0,
            grid=(grid_r, grid_c),
            in_specs=[logit_spec, logit_spec],
            out_specs=[partial_spec, partial_spec],
            scratch_shapes=[pltpu.VMEM((tile_r, 1), jnp.float32) for _ in range(6)],
        ),
        compiler_params=pltpu.CompilerParams(
            dimension_semantics=("parallel", "arbitrary"),
            vmem_limit_bytes=vmem_limit),
        cost_estimate=pl.CostEstimate(
            flops=12 * R * C,
            transcendentals=2 * R,
            bytes_accessed=2 * R * C * itemsize + 8 * int(grid_r)),
    )(lt, ls)

    std_t = jnp.sum(sums_t) / R            # mean over the TRUE row count
    std_s = jnp.sum(sums_s) / R

    # Tiny 2 -> 128 -> 1 MLP runs exactly once: plain JAX in the wrapper
    # (negligible cost; removes 4 resident VMEM params + finalize from the kernel).
    x = jnp.stack([std_t, std_s]).astype(jnp.float32)
    h = jnp.maximum(x @ w1_t + b1, 0.0)                        # ReLU
    logit = h @ w2[0] + b2[0]
    return (0.1 + 9.9 * jax.nn.sigmoid(logit)).reshape(1)      # matches torch shape (1,)


def init_params(key, in_features=2, hidden=128):
    """Deterministic PyTorch-style uniform init U(-1/sqrt(fan_in), 1/sqrt(fan_in))."""
    k1, k2, k3, k4 = jax.random.split(key, 4)
    lim1 = 1.0 / np.sqrt(in_features)
    lim2 = 1.0 / np.sqrt(hidden)
    w1 = jax.random.uniform(k1, (hidden, in_features), jnp.float32, -lim1, lim1)
    b1 = jax.random.uniform(k2, (hidden,), jnp.float32, -lim1, lim1)
    w2 = jax.random.uniform(k3, (1, hidden), jnp.float32, -lim2, lim2)
    b2 = jax.random.uniform(k4, (1,), jnp.float32, -lim2, lim2)
    # store W1 transposed (in, hidden) for the wrapper-side x @ W1^T
    return (w1.T, b1, w2, b2)


def _reference(logit_t, logit_s, params):
    """Pure-JAX reference of the PyTorch forward (std computed in f32)."""
    w1_t, b1, w2, b2 = params
    lt = logit_t.astype(jnp.float32)
    ls = logit_s.astype(jnp.float32)
    std_t = jnp.mean(jnp.std(lt, axis=-1, ddof=1))
    std_s = jnp.mean(jnp.std(ls, axis=-1, ddof=1))
    x = jnp.stack([std_t, std_s])                              # (2,)
    h = jnp.maximum(x @ w1_t + b1, 0.0)                        # (H,)
    t = jax.nn.sigmoid(h @ w2[0] + b2[0])                      # scalar
    return (0.1 + 9.9 * t).reshape(1)


if __name__ == "__main__":
    key = jax.random.PRNGKey(0)
    kp, kt, ks = jax.random.split(key, 3)

    params = init_params(kp)

    # Small but non-trivial shapes: 2 x 11 = 22 rows, 300 classes, bf16 logits,
    # with a non-zero mean offset to exercise the shift-stabilized variance.
    logit_t = (jax.random.normal(kt, (2, 11, 300), jnp.float32) * 3.0 + 1.5).astype(jnp.bfloat16)
    logit_s = (jax.random.normal(ks, (2, 11, 300), jnp.float32) * 1.5 - 0.5).astype(jnp.bfloat16)

    ref = _reference(logit_t, logit_s, params)

    # 1) Default byte-budget tiling: a single (22, 300) block, no masking paths.
    out = jax.block_until_ready(adaptive_temperature(logit_t, logit_s, params))
    assert out.shape == (1,)
    assert np.allclose(np.asarray(out), np.asarray(ref), rtol=1e-4, atol=1e-4), (out, ref)

    # 2) Forced small tiles: multi-tile streaming in both grid dims plus the
    #    in-kernel row (22 -> 2x16) and class (300 -> 3x128) edge masks.
    out2 = jax.block_until_ready(
        adaptive_temperature(logit_t, logit_s, params, tile_r=16, tile_c=128))
    assert np.allclose(np.asarray(out2), np.asarray(ref), rtol=1e-4, atol=1e-4), (out2, ref)

    print("KERNEL_OK")
</pallas_src>

<mosaic_0001>
module attributes {stable_mosaic.version = 11 : i64} {
  func.func @_std_partial_kernel(%arg0: i32, %arg1: i32, %arg2: memref<22x300xbf16, #tpu.memory_space<vmem>>, %arg3: memref<22x300xbf16, #tpu.memory_space<vmem>>, %arg4: memref<1x1x1xf32, #tpu.memory_space<vmem>>, %arg5: memref<1x1x1xf32, #tpu.memory_space<vmem>>, %arg6: memref<22x1xf32, #tpu.memory_space<vmem>>, %arg7: memref<22x1xf32, #tpu.memory_space<vmem>>, %arg8: memref<22x1xf32, #tpu.memory_space<vmem>>, %arg9: memref<22x1xf32, #tpu.memory_space<vmem>>, %arg10: memref<22x1xf32, #tpu.memory_space<vmem>>, %arg11: memref<22x1xf32, #tpu.memory_space<vmem>>) attributes {dimension_semantics = [#tpu.dimension_semantics<parallel>, #tpu.dimension_semantics<arbitrary>], iteration_bounds = array<i64: 1, 1>, scalar_prefetch = 0 : i64, scratch_operands = 6 : i64, tpu.core_type = #tpu.core_type<tc>, window_params = [{transform_indices = @transform_0, window_bounds = array<i64: 22, 300>}, {transform_indices = @transform_1, window_bounds = array<i64: 22, 300>}, {transform_indices = @transform_2, window_bounds = array<i64: 1, 1, 1>}, {transform_indices = @transform_3, window_bounds = array<i64: 1, 1, 1>}]} {
    %c0 = arith.constant 0 : index
    %c0_0 = arith.constant 0 : index
    %0 = vector.load %arg2[%c0, %c0_0] : memref<22x300xbf16, #tpu.memory_space<vmem>>, vector<22x300xbf16>
    %1 = arith.extf %0 : vector<22x300xbf16> to vector<22x300xf32>
    %c0_1 = arith.constant 0 : index
    %c0_2 = arith.constant 0 : index
    %2 = vector.load %arg3[%c0_1, %c0_2] : memref<22x300xbf16, #tpu.memory_space<vmem>>, vector<22x300xbf16>
    %3 = arith.extf %2 : vector<22x300xbf16> to vector<22x300xf32>
    %c0_i32 = arith.constant 0 : i32
    %4 = arith.cmpi eq, %arg1, %c0_i32 : i32
    %5 = arith.extui %4 : i1 to i32
    %c0_i32_3 = arith.constant 0 : i32
    %6 = arith.cmpi ne, %5, %c0_i32_3 : i32
    scf.if %6 {
      %35 = vector.extract_strided_slice %1 {offsets = [0, 0], sizes = [22, 1], strides = [1, 1]} : vector<22x300xf32> to vector<22x1xf32>
      %c0_30 = arith.constant 0 : index
      %c0_31 = arith.constant 0 : index
      %36 = vector.load %arg8[%c0_30, %c0_31] : memref<22x1xf32, #tpu.memory_space<vmem>>, vector<22x1xf32>
      tpu.vector_store %arg8[%c0_30, %c0_31], %35 {strides = array<i32>} : memref<22x1xf32, #tpu.memory_space<vmem>>, vector<22x1xf32>,
      %37 = vector.extract_strided_slice %3 {offsets = [0, 0], sizes = [22, 1], strides = [1, 1]} : vector<22x300xf32> to vector<22x1xf32>
      %c0_32 = arith.constant 0 : index
      %c0_33 = arith.constant 0 : index
      %38 = vector.load %arg11[%c0_32, %c0_33] : memref<22x1xf32, #tpu.memory_space<vmem>>, vector<22x1xf32>
      tpu.vector_store %arg11[%c0_32, %c0_33], %37 {strides = array<i32>} : memref<22x1xf32, #tpu.memory_space<vmem>>, vector<22x1xf32>,
      %cst_34 = arith.constant 0.000000e+00 : f32
      %39 = vector.broadcast %cst_34 : f32 to vector<22x1xf32>
      %c0_35 = arith.constant 0 : index
      %c0_36 = arith.constant 0 : index
      %40 = vector.load %arg6[%c0_35, %c0_36] : memref<22x1xf32, #tpu.memory_space<vmem>>, vector<22x1xf32>
      tpu.vector_store %arg6[%c0_35, %c0_36], %39 {strides = array<i32>} : memref<22x1xf32, #tpu.memory_space<vmem>>, vector<22x1xf32>,
      %cst_37 = arith.constant 0.000000e+00 : f32
      %41 = vector.broadcast %cst_37 : f32 to vector<22x1xf32>
      %c0_38 = arith.constant 0 : index
      %c0_39 = arith.constant 0 : index
      %42 = vector.load %arg7[%c0_38, %c0_39] : memref<22x1xf32, #tpu.memory_space<vmem>>, vector<22x1xf32>
      tpu.vector_store %arg7[%c0_38, %c0_39], %41 {strides = array<i32>} : memref<22x1xf32, #tpu.memory_space<vmem>>, vector<22x1xf32>,
      %cst_40 = arith.constant 0.000000e+00 : f32
      %43 = vector.broadcast %cst_40 : f32 to vector<22x1xf32>
      %c0_41 = arith.constant 0 : index
      %c0_42 = arith.constant 0 : index
      %44 = vector.load %arg9[%c0_41, %c0_42] : memref<22x1xf32, #tpu.memory_space<vmem>>, vector<22x1xf32>
      tpu.vector_store %arg9[%c0_41, %c0_42], %43 {strides = array<i32>} : memref<22x1xf32, #tpu.memory_space<vmem>>, vector<22x1xf32>,
      %cst_43 = arith.constant 0.000000e+00 : f32
      %45 = vector.broadcast %cst_43 : f32 to vector<22x1xf32>
      %c0_44 = arith.constant 0 : index
      %c0_45 = arith.constant 0 : index
      %46 = vector.load %arg10[%c0_44, %c0_45] : memref<22x1xf32, #tpu.memory_space<vmem>>, vector<22x1xf32>
      tpu.vector_store %arg10[%c0_44, %c0_45], %45 {strides = array<i32>} : memref<22x1xf32, #tpu.memory_space<vmem>>, vector<22x1xf32>,
    } else {
    }
    %c0_4 = arith.constant 0 : index
    %c0_5 = arith.constant 0 : index
    %7 = vector.load %arg8[%c0_4, %c0_5] : memref<22x1xf32, #tpu.memory_space<vmem>>, vector<22x1xf32>
    %8 = vector.broadcast %7 : vector<22x1xf32> to vector<22x300xf32>
    %9 = arith.subf %1, %8 : vector<22x300xf32>
    %c0_6 = arith.constant 0 : index
    %c0_7 = arith.constant 0 : index
    %10 = vector.load %arg11[%c0_6, %c0_7] : memref<22x1xf32, #tpu.memory_space<vmem>>, vector<22x1xf32>
    %11 = vector.broadcast %10 : vector<22x1xf32> to vector<22x300xf32>
    %12 = arith.subf %3, %11 : vector<22x300xf32>
    %cst = arith.constant 1.000000e+00 : f32
    %13 = vector.broadcast %cst : f32 to vector<300x1xf32>
    %c0_8 = arith.constant 0 : index
    %c0_9 = arith.constant 0 : index
    %14 = vector.load %arg6[%c0_8, %c0_9] : memref<22x1xf32, #tpu.memory_space<vmem>>, vector<22x1xf32>
    %cst_10 = arith.constant dense<0.000000e+00> : vector<22x1xf32>
    %15 = tpu.matmul %9, %13, %cst_10 {dimension_numbers = #tpu.dot_dimension_numbers<[1], [0], [0], [1], [0, 0, 1, 1], [], []>} : vector<22x300xf32>, vector<300x1xf32>, vector<22x1xf32> -> vector<22x1xf32>
    %16 = arith.addf %14, %15 : vector<22x1xf32>
    %c0_11 = arith.constant 0 : index
    %c0_12 = arith.constant 0 : index
    %17 = vector.load %arg6[%c0_11, %c0_12] : memref<22x1xf32, #tpu.memory_space<vmem>>, vector<22x1xf32>
    tpu.vector_store %arg6[%c0_11, %c0_12], %16 {strides = array<i32>} : memref<22x1xf32, #tpu.memory_space<vmem>>, vector<22x1xf32>,
    %c0_13 = arith.constant 0 : index
    %c0_14 = arith.constant 0 : index
    %18 = vector.load %arg7[%c0_13, %c0_14] : memref<22x1xf32, #tpu.memory_space<vmem>>, vector<22x1xf32>
    %19 = arith.mulf %9, %9 : vector<22x300xf32>
    %cst_15 = arith.constant dense<0.000000e+00> : vector<22x1xf32>
    %20 = tpu.matmul %19, %13, %cst_15 {dimension_numbers = #tpu.dot_dimension_numbers<[1], [0], [0], [1], [0, 0, 1, 1], [], []>} : vector<22x300xf32>, vector<300x1xf32>, vector<22x1xf32> -> vector<22x1xf32>
    %21 = arith.addf %18, %20 : vector<22x1xf32>
    %c0_16 = arith.constant 0 : index
    %c0_17 = arith.constant 0 : index
    %22 = vector.load %arg7[%c0_16, %c0_17] : memref<22x1xf32, #tpu.memory_space<vmem>>, vector<22x1xf32>
    tpu.vector_store %arg7[%c0_16, %c0_17], %21 {strides = array<i32>} : memref<22x1xf32, #tpu.memory_space<vmem>>, vector<22x1xf32>,
    %c0_18 = arith.constant 0 : index
    %c0_19 = arith.constant 0 : index
    %23 = vector.load %arg9[%c0_18, %c0_19] : memref<22x1xf32, #tpu.memory_space<vmem>>, vector<22x1xf32>
    %cst_20 = arith.constant dense<0.000000e+00> : vector<22x1xf32>
    %24 = tpu.matmul %12, %13, %cst_20 {dimension_numbers = #tpu.dot_dimension_numbers<[1], [0], [0], [1], [0, 0, 1, 1], [], []>} : vector<22x300xf32>, vector<300x1xf32>, vector<22x1xf32> -> vector<22x1xf32>
    %25 = arith.addf %23, %24 : vector<22x1xf32>
    %c0_21 = arith.constant 0 : index
    %c0_22 = arith.constant 0 : index
    %26 = vector.load %arg9[%c0_21, %c0_22] : memref<22x1xf32, #tpu.memory_space<vmem>>, vector<22x1xf32>
    tpu.vector_store %arg9[%c0_21, %c0_22], %25 {strides = array<i32>} : memref<22x1xf32, #tpu.memory_space<vmem>>, vector<22x1xf32>,
    %c0_23 = arith.constant 0 : index
    %c0_24 = arith.constant 0 : index
    %27 = vector.load %arg10[%c0_23, %c0_24] : memref<22x1xf32, #tpu.memory_space<vmem>>, vector<22x1xf32>
    %28 = arith.mulf %12, %12 : vector<22x300xf32>
    %cst_25 = arith.constant dense<0.000000e+00> : vector<22x1xf32>
    %29 = tpu.matmul %28, %13, %cst_25 {dimension_numbers = #tpu.dot_dimension_numbers<[1], [0], [0], [1], [0, 0, 1, 1], [], []>} : vector<22x300xf32>, vector<300x1xf32>, vector<22x1xf32> -> vector<22x1xf32>
    %30 = arith.addf %27, %29 : vector<22x1xf32>
    %c0_26 = arith.constant 0 : index
    %c0_27 = arith.constant 0 : index
    %31 = vector.load %arg10[%c0_26, %c0_27] : memref<22x1xf32, #tpu.memory_space<vmem>>, vector<22x1xf32>
    tpu.vector_store %arg10[%c0_26, %c0_27], %30 {strides = array<i32>} : memref<22x1xf32, #tpu.memory_space<vmem>>, vector<22x1xf32>,
    %c0_i32_28 = arith.constant 0 : i32
    %32 = arith.cmpi eq, %arg1, %c0_i32_28 : i32
    %33 = arith.extui %32 : i1 to i32
    %c0_i32_29 = arith.constant 0 : i32
    %34 = arith.cmpi ne, %33, %c0_i32_29 : i32
    scf.if %34 {
      %c0_30 = arith.constant 0 : index
      %c0_31 = arith.constant 0 : index
      %35 = vector.load %arg7[%c0_30, %c0_31] : memref<22x1xf32, #tpu.memory_space<vmem>>, vector<22x1xf32>
      %c0_32 = arith.constant 0 : index
      %c0_33 = arith.constant 0 : index
      %36 = vector.load %arg6[%c0_32, %c0_33] : memref<22x1xf32, #tpu.memory_space<vmem>>, vector<22x1xf32>
      %c0_34 = arith.constant 0 : index
      %c0_35 = arith.constant 0 : index
      %37 = vector.load %arg6[%c0_34, %c0_35] : memref<22x1xf32, #tpu.memory_space<vmem>>, vector<22x1xf32>
      %38 = arith.mulf %36, %37 : vector<22x1xf32>
      %cst_36 = arith.constant 0.00333333341 : f32
      %39 = vector.broadcast %cst_36 : f32 to vector<22x1xf32>
      %40 = arith.mulf %38, %39 : vector<22x1xf32>
      %41 = arith.subf %35, %40 : vector<22x1xf32>
      %cst_37 = arith.constant 0.00334448158 : f32
      %42 = vector.broadcast %cst_37 : f32 to vector<22x1xf32>
      %43 = arith.mulf %41, %42 : vector<22x1xf32>
      %c0_38 = arith.constant 0 : index
      %c0_39 = arith.constant 0 : index
      %44 = vector.load %arg10[%c0_38, %c0_39] : memref<22x1xf32, #tpu.memory_space<vmem>>, vector<22x1xf32>
      %c0_40 = arith.constant 0 : index
      %c0_41 = arith.constant 0 : index
      %45 = vector.load %arg9[%c0_40, %c0_41] : memref<22x1xf32, #tpu.memory_space<vmem>>, vector<22x1xf32>
      %c0_42 = arith.constant 0 : index
      %c0_43 = arith.constant 0 : index
      %46 = vector.load %arg9[%c0_42, %c0_43] : memref<22x1xf32, #tpu.memory_space<vmem>>, vector<22x1xf32>
      %47 = arith.mulf %45, %46 : vector<22x1xf32>
      %cst_44 = arith.constant 0.00333333341 : f32
      %48 = vector.broadcast %cst_44 : f32 to vector<22x1xf32>
      %49 = arith.mulf %47, %48 : vector<22x1xf32>
      %50 = arith.subf %44, %49 : vector<22x1xf32>
      %cst_45 = arith.constant 0.00334448158 : f32
      %51 = vector.broadcast %cst_45 : f32 to vector<22x1xf32>
      %52 = arith.mulf %50, %51 : vector<22x1xf32>
      %cst_46 = arith.constant 0.000000e+00 : f32
      %53 = vector.broadcast %cst_46 : f32 to vector<22x1xf32>
      %54 = arith.maximumf %43, %53 : vector<22x1xf32>
      %55 = math.sqrt %54 : vector<22x1xf32>
      %cst_47 = arith.constant 0.000000e+00 : f32
      %56 = vector.broadcast %cst_47 : f32 to vector<22x1xf32>
      %57 = arith.maximumf %52, %56 : vector<22x1xf32>
      %58 = math.sqrt %57 : vector<22x1xf32>
      %59 = vector.shape_cast %55 : vector<22x1xf32> to vector<1x22x1xf32>
      %cst_48 = arith.constant dense<0.000000e+00> : vector<1xf32>
      %60 = vector.multi_reduction <add>, %59, %cst_48 [1, 2] : vector<1x22x1xf32> to vector<1xf32>
      %61 = vector.shape_cast %60 : vector<1xf32> to vector<1x1x1xf32>
      %62 = vector.extract %61[0, 0, 0] : f32 from vector<1x1x1xf32>
      %63 = vector.broadcast %62 : f32 to vector<1x1x1xf32>
      %c0_49 = arith.constant 0 : index
      %c0_50 = arith.constant 0 : index
      %c0_51 = arith.constant 0 : index
      %64 = vector.load %arg4[%c0_49, %c0_50, %c0_51] : memref<1x1x1xf32, #tpu.memory_space<vmem>>, vector<1x1x1xf32>
      tpu.vector_store %arg4[%c0_49, %c0_50, %c0_51], %63 {strides = array<i32>} : memref<1x1x1xf32, #tpu.memory_space<vmem>>, vector<1x1x1xf32>,
      %65 = vector.shape_cast %58 : vector<22x1xf32> to vector<1x22x1xf32>
      %cst_52 = arith.constant dense<0.000000e+00> : vector<1xf32>
      %66 = vector.multi_reduction <add>, %65, %cst_52 [1, 2] : vector<1x22x1xf32> to vector<1xf32>
      %67 = vector.shape_cast %66 : vector<1xf32> to vector<1x1x1xf32>
      %68 = vector.extract %67[0, 0, 0] : f32 from vector<1x1x1xf32>
      %69 = vector.broadcast %68 : f32 to vector<1x1x1xf32>
      %c0_53 = arith.constant 0 : index
      %c0_54 = arith.constant 0 : index
      %c0_55 = arith.constant 0 : index
      %70 = vector.load %arg5[%c0_53, %c0_54, %c0_55] : memref<1x1x1xf32, #tpu.memory_space<vmem>>, vector<1x1x1xf32>
      tpu.vector_store %arg5[%c0_53, %c0_54, %c0_55], %69 {strides = array<i32>} : memref<1x1x1xf32, #tpu.memory_space<vmem>>, vector<1x1x1xf32>,
    } else {
    }
    return
  }
  func.func @transform_0(%arg0: i32, %arg1: i32) -> (i32, i32) {
    %c0_i32 = arith.constant 0 : i32
    return %arg0, %arg1 : i32, i32
  }
  func.func @transform_1(%arg0: i32, %arg1: i32) -> (i32, i32) {
    %c0_i32 = arith.constant 0 : i32
    return %arg0, %arg1 : i32, i32
  }
  func.func @transform_2(%arg0: i32, %arg1: i32) -> (i32, i32, i32) {
    %c0_i32 = arith.constant 0 : i32
    %c0_i32_0 = arith.constant 0 : i32
    %c0_i32_1 = arith.constant 0 : i32
    return %arg0, %c0_i32, %c0_i32_0 : i32, i32, i32
  }
  func.func @transform_3(%arg0: i32, %arg1: i32) -> (i32, i32, i32) {
    %c0_i32 = arith.constant 0 : i32
    %c0_i32_0 = arith.constant 0 : i32
    %c0_i32_1 = arith.constant 0 : i32
    return %arg0, %c0_i32, %c0_i32_0 : i32, i32, i32
  }
}

</mosaic_0001>

<bundles_post_ra>
// kernel: tpu_custom_call.1
= control target key start
LH: loop header
LB: loop body
LE: loop exit
PB: predicated region body
PF: predicated region fallthrough
CT: control target
= control target key end

     0   :  { %9 = vsyncpa [#allocation9], 0  ;;  %s1890_s0 = inlined_call_operand.hbm [shape: bf16[22,300], index: 0, kind: input, shape index: {}]   ;;  %s1891_s1 = inlined_call_operand.hbm [shape: bf16[22,300], index: 1, kind: input, shape index: {}]   ;;  %s1892_s2 = inlined_call_operand.hbm [shape: f32[1,1,1], index: 2, kind: output, shape index: {0}]   ;;  %s1893_s3 = inlined_call_operand.hbm [shape: f32[1,1,1], index: 3, kind: output, shape index: {1}]  }
   0x1   :  { %10 = vsyncpa [#allocation12], 0 }
   0x2   :  { %11 = vsyncpa [#allocation10], 0 }
   0x3   :  { %12 = vsyncpa [#allocation15], 0  ;;  %s1556_s12 = smov [#allocation8]   ;;  %s1460_s16 = scalar_lea.hbm %s1890_s0, 576 }
   0x4   :  { %s18_s13 = sshll.u32 %s1556_s12, 4  ;;  %p1461_p0 = scmp.ne.s32.totalorder %s1890_s0, %s1460_s16  ;;  %s19_s13 = int_to_ptr.vmem [resolvable:$true] %s18_s13 }
   0x5   :  { %p1464_p1 = scmp.lt.u32.totalorder %s1460_s16, %s1890_s0 }
   0x7   :  { %p1466_p2 = pnand %p1464_p1, %p1461_p0 }
   0x9   :  { %1469 = shalt.err (!%p1466_p2)
}
   0xa   :  { %s1470_s21 = scalar_lea.vmem %s19_s13, 576  ;;  %p1475_p4 = scmp.lt.s32.totalorder %s19_s13, %s19_s13 }
   0xb   :  { %p1471_p3 = scmp.ne.s32.totalorder %s19_s13, %s1470_s21  ;;  %p1476_p5 = scmp.lt.s32.totalorder %s1470_s21, %s1470_s21 }
   0xd   :  { %p1477_p6 = por %p1476_p5, %p1475_p4 }
   0xf   :  { %p1478_p7 = pnand %p1477_p6, %p1471_p3 }
  0x11   :  { %1481 = shalt.err (!%p1478_p7)
}
  0x12   :  { %s1557_s22 = smov 192   ;;  %s1558_s23 = smov 12  }
  0x13   :  { %24 = dma.hbm_to_vmem [thread:$0]  %s1890_s0, 576, %s19_s13, [#allocation9], %s1557_s22, %s1557_s22, %s1558_s23  }
  0x14   :  { %s1559_s26 = smov [#allocation11]   ;;  %s1482_s30 = scalar_lea.hbm %s1891_s1, 576 }
  0x15   :  { %s30_s27 = sshll.u32 %s1559_s26, 4  ;;  %p1483_p8 = scmp.ne.s32.totalorder %s1891_s1, %s1482_s30  ;;  %s31_s27 = int_to_ptr.vmem [resolvable:$true] %s30_s27 }
  0x16   :  { %p1486_p9 = scmp.lt.u32.totalorder %s1482_s30, %s1891_s1 }
  0x18   :  { %p1488_p10 = pnand %p1486_p9, %p1483_p8 }
  0x1a   :  { %1491 = shalt.err (!%p1488_p10)
}
  0x1b   :  { %s1492_s8 = scalar_lea.vmem %s31_s27, 576  ;;  %p1497_p12 = scmp.lt.s32.totalorder %s31_s27, %s31_s27 }
  0x1c   :  { %p1493_p11 = scmp.ne.s32.totalorder %s31_s27, %s1492_s8  ;;  %p1498_p13 = scmp.lt.s32.totalorder %s1492_s8, %s1492_s8 }
  0x1e   :  { %p1499_p0 = por %p1498_p13, %p1497_p12 }
  0x20   :  { %p1500_p1 = pnand %p1499_p0, %p1493_p11 }
  0x22   :  { %1503 = shalt.err (!%p1500_p1)
}
  0x23   :  { %36 = dma.hbm_to_vmem [thread:$0]  %s1891_s1, 576, %s31_s27, [#allocation12], %s1557_s22, %s1557_s22, %s1558_s23  }
  0x24   :  { %1548 = dma.done.wait [#allocation9], 576  }
  0x25   :  { %1549 = vsyncadd [#allocation9], 4294966720 }
  0x26   :  { %1550 = dma.done.wait [#allocation12], 576  }
  0x27   :  { %1551 = vsyncadd [#allocation12], 4294966720  ;;  %v1560_v0 = vmov 0   ;;  %v1561_v1 = vmov 1.0|1.0   ;;  %v1562_v2 = vmov 0.0|0.0  }
  0x28   :  { %1446 = vset.pattern.permute.xlu0 %v1560_v0  ;;  %1447 = vset.pattern.permute.xlu1 %v1560_v0  ;;  %vm164_vm0 = vcmask 1043456   ;;  %vm1563_vm1 = vmmov 1   ;;  %v1622_v4 = vld [vmem:[#allocation8] sm:$0xff]  ;;  %vm77_vm3 = vcmask 7168   ;;  %v1624_v5 = vld [vmem:[#allocation8 + $0xc] sm:$0xff]  ;;  %vm80_vm4 = vcmask 5120  }
  0x29   :  { %1338 = vmatprep.subr.bf16.mxu0 %v1561_v1  ;;  %1354 = vmatprep.subr.bf16.mxu1 %v1562_v2  ;;  %vm1618_vm2 = vmpackc.low %vm164_vm0, %vm1563_vm1  ;;  %v1626_v6 = vld [vmem:[#allocation8 + $0x18] sm:$0x77]  ;;  %v49_v7 = vunpack.c.l.bf16 %v1622_v4  ;;  %v52_v8 = vunpack.c.l.bf16 %v1624_v5  ;;  %v1633_v10 = vld [vmem:[#allocation11 + $0xc] sm:$0xff]  ;;  %vm1564_vm5 = vmmov 0   ;;  %v1565_v20 = vmov 0.0   ;;  %s1566_s1 = smov [#allocation13]  }
  0x2a   :  { %1339 = vmatpush3.bf16.msra.mxu0 %v1561_v1  ;;  %1355 = vmatpush3.bf16.msra.mxu1 %v1561_v1  ;;  %v55_v9 = vunpack.c.l.bf16 %v1626_v6  ;;  %v1635_v11 = vld [vmem:[#allocation11] sm:$0xff]  ;;  %v1637_v12 = vld [vmem:[#allocation11 + $0x18] sm:$0x77]  ;;  %v67_v13 = vunpack.c.l.bf16 %v1633_v10  ;;  %85 = vst.msk [vmem:[#allocation2] sm:$0xff] %vm77_vm3, %v1565_v20  ;;  %86 = vst.msk [vmem:[#allocation2 + $0x8] sm:$0xff] %vm77_vm3, %v1565_v20  ;;  %v50_v25 = vunpack.c.h.bf16 %v1622_v4  ;;  %vm154_vm6 = vcmask 359424  }
  0x2b   :  { %1340 = vmatprep.subr.bf16.mxu0 %v1561_v1  ;;  %1356 = vmatprep.subr.bf16.mxu1 %v1562_v2  ;;  %v64_v14 = vunpack.c.l.bf16 %v1635_v11  ;;  %v70_v15 = vunpack.c.l.bf16 %v1637_v12  ;;  %78 = vst.msk [vmem:[#allocation4] sm:$0xff] %vm77_vm3, %v49_v7  ;;  %79 = vst.msk [vmem:[#allocation4 + $0x8] sm:$0xff] %vm77_vm3, %v52_v8  ;;  %v44_v23 = vld [vmem:[#allocation8 + $0x8] ss:$12 sps:$4 sm:$0xff]   ;;  %v53_v27 = vunpack.c.h.bf16 %v1624_v5  ;;  %v48_v28 = vld [vmem:[#allocation8 + $0x20] sm:$0x7]  ;;  %v56_v33 = vunpack.c.h.bf16 %v1626_v6 }
  0x2c   :  { %81 = vst.msk [vmem:[#allocation4 + $0x10] sm:$0x3f] %vm80_vm4, %v55_v9  ;;  %1266 = vmatprep.mubr.msk.f32.mxu1 %vm1564_vm5, %v1565_v20  ;;  %87 = vst.msk [vmem:[#allocation2 + $0x10] sm:$0x3f] %vm80_vm4, %v1565_v20  ;;  %v51_v24 = vunpack.c.l.bf16 %v44_v23  ;;  %v54_v32 = vunpack.c.h.bf16 %v44_v23  ;;  %v57_v34 = vunpack.c.l.bf16 %v48_v28  ;;  %v65_v46 = vunpack.c.h.bf16 %v1635_v11  ;;  %v61_v54 = vld [vmem:[#allocation11 + $0x8] ss:$12 sps:$4 sm:$0xff]  }
  0x2d   :  { %83 = vst.msk [vmem:[#allocation7 + $0x8] sm:$0xff] %vm77_vm3, %v67_v13  ;;  %82 = vst.msk [vmem:[#allocation7] sm:$0xff] %vm77_vm3, %v64_v14  ;;  %v66_v55 = vunpack.c.l.bf16 %v61_v54  ;;  %v68_v57 = vunpack.c.h.bf16 %v1633_v10  ;;  %v69_v59 = vunpack.c.h.bf16 %v61_v54  ;;  %v63_v62 = vld [vmem:[#allocation11 + $0x20] sm:$0x7]  ;;  %v71_v0 = vunpack.c.h.bf16 %v1637_v12  ;;  %s1014_s10 = sshll.u32 %s1566_s1, 4  ;;  %s1015_s10 = int_to_ptr.vmem [resolvable:$true] %s1014_s10 }
  0x2e   :  { %1341 = vmatpush3.bf16.msra.mxu0 %v1561_v1  ;;  %1357 = vmatpush3.bf16.msra.mxu1 %v1561_v1  ;;  %84 = vst.msk [vmem:[#allocation7 + $0x10] sm:$0x3f] %vm80_vm4, %v70_v15  ;;  %90 = vst.msk [vmem:[#allocation3 + $0x10] sm:$0x3f] %vm80_vm4, %v1565_v20  ;;  %v72_v6 = vunpack.c.l.bf16 %v63_v62  ;;  %s1504_s12 = scalar_lea.vmem %s1015_s10, 16  ;;  %s1508_s13 = scalar_lea.vmem %s1015_s10, 32 }
  0x2f   :  { %1342 = vmatprep.subr.bf16.mxu0 %v1561_v1  ;;  %1358 = vmatprep.subr.bf16.mxu1 %v1562_v2  ;;  %88 = vst.msk [vmem:[#allocation3] sm:$0xff] %vm77_vm3, %v1565_v20  ;;  %89 = vst.msk [vmem:[#allocation3 + $0x8] sm:$0xff] %vm77_vm3, %v1565_v20  ;;  %p1505_p2 = scmp.ne.s32.totalorder %s1015_s10, %s1504_s12  ;;  %p1509_p3 = scmp.lt.s32.totalorder %s1015_s10, %s1015_s10 }
  0x30   :  { %91 = vst.msk [vmem:[#allocation5] sm:$0xff] %vm77_vm3, %v1565_v20  ;;  %92 = vst.msk [vmem:[#allocation5 + $0x8] sm:$0xff] %vm77_vm3, %v1565_v20  ;;  %p1510_p4 = scmp.lt.s32.totalorder %s1508_s13, %s1504_s12 }
  0x31   :  { %93 = vst.msk [vmem:[#allocation5 + $0x10] sm:$0x3f] %vm80_vm4, %v1565_v20  ;;  %96 = vst.msk [vmem:[#allocation6 + $0x10] sm:$0x3f] %vm80_vm4, %v1565_v20  ;;  %v151_v23 = vld [vmem:[#allocation2] sm:$0xff] }
  0x32   :  { %1343 = vmatpush3.bf16.msra.mxu0 %v1561_v1  ;;  %1360 = vmatpush3.bf16.msk.msra.mxu1 %vm1618_vm2, %v1561_v1  ;;  %v97_v16 = vld [vmem:[#allocation4] sm:$0xff]  ;;  %v98_v18 = vld [vmem:[#allocation4 + $0x8] sm:$0xff]  ;;  %94 = vst.msk [vmem:[#allocation6] sm:$0xff] %vm77_vm3, %v1565_v20  ;;  %95 = vst.msk [vmem:[#allocation6 + $0x8] sm:$0xff] %vm77_vm3, %v1565_v20  ;;  %p1511_p5 = por %p1510_p4, %p1509_p3 }
  0x33   :  { %1344 = vmatprep.subr.bf16.mxu0 %v1561_v1  ;;  %1361 = vmatprep.subr.bf16.mxu1 %v1561_v1  ;;  %v99_v17 = vld [vmem:[#allocation4 + $0x10] sm:$0x3f] }
  0x34   :  { %102 = vperm.xlu0 %1446, %v97_v16   ;;  %112 = vperm.xlu1 %1447, %v99_v17   ;;  %v124_v19 = vld [vmem:[#allocation7] sm:$0xff]  ;;  %v125_v21 = vld [vmem:[#allocation7 + $0x8] sm:$0xff]  ;;  %p1512_p6 = pnand %p1511_p5, %p1505_p2 }
  0x35   :  { %v126_v22 = vld [vmem:[#allocation7 + $0x10] sm:$0x3f] }
  0x36   :  { %1345 = vmatpush3.bf16.msra.mxu0 %v1561_v1 }
  0x37   :  { %1346 = vmatprep.subr.bf16.mxu0 %v1561_v1 }
  0x38   :  { %107 = vperm.xlu0 %1446, %v98_v18   ;;  %129 = vperm.xlu1 %1447, %v124_v19  }
  0x3a   :  { %1347 = vmatpush3.bf16.msra.mxu0 %v1561_v1 }
  0x3b   :  { %1348 = vmatprep.subr.bf16.mxu0 %v1561_v1 }
  0x3c   :  { %134 = vperm.xlu0 %1446, %v125_v21   ;;  %139 = vperm.xlu1 %1447, %v126_v22  }
  0x3e   :  { %1349 = vmatpush3.bf16.msra.mxu0 %v1561_v1 }
  0x3f   :  { %1350 = vmatprep.subr.bf16.mxu0 %v1561_v1 }
  0x42   :  { %1351 = vmatpush3.bf16.msra.mxu0 %v1561_v1 }
  0x43   :  { %1352 = vmatprep.subr.bf16.mxu0 %v1561_v1 }
  0x46   :  { %1353 = vmatpush3.bf16.msra.mxu0 %v1561_v1 }
  0x47   :  { %1377 = vmatprep.subr.bf16.mxu0 %v1562_v2 }
  0xb3   :  { %v103_v26 = vpop.permute.xlu0 %102  ;;  %v113_v35 = vpop.permute.xlu1 %112 }
  0xb4   :  { %v1708_v29 = vsub.f32 %v49_v7, %v103_v26  ;;  %v117_v30 = vsub.f32 %v51_v24, %v103_v26  ;;  %v116_v31 = vsub.f32 %v50_v25, %v103_v26  ;;  %v122_v40 = vsub.f32 %v56_v33, %v113_v35 }
  0xb5   :  { %v123_v41 = vsub.f32 %v57_v34, %v113_v35  ;;  %v1727_v42 = vsub.f32 %v55_v9, %v113_v35 }
  0xb6   :  { %232 = vmatprep.mubr.f32.mxu0 %v116_v31  ;;  %1267 = vmatmul.mubr.msk.f32.vlgmr.msra.gmra.mrb[0].mxu1 %vm154_vm6, %v117_v30  ;;  %v340_v43 = vmul.f32 %v116_v31, %v116_v31  ;;  %v341_v44 = vmul.f32 %v117_v30, %v117_v30  ;;  %v339_v50 = vmul.f32 %v1708_v29, %v1708_v29  ;;  %v152_v30 = vld [vmem:[#allocation2 + $0x8] sm:$0xff] }
  0xb7   :  { %1362 = vmatpush3.bf16.msra.mxu1 %v1561_v1  ;;  %233 = vmatmul.mubr.f32.vlgmr.msra.gmra.mrb[0].mxu0 %v1708_v29  ;;  %v108_v36 = vpop.permute.xlu0 %107  ;;  %v347_v47 = vmul.f32 %v123_v41, %v123_v41  ;;  %v130_v48 = vpop.permute.xlu1 %129  ;;  %v346_v53 = vmul.f32 %v122_v40, %v122_v40  ;;  %v345_v56 = vmul.f32 %v1727_v42, %v1727_v42 }
  0xb8   :  { %1378 = vmatpush3.bf16.msra.mxu0 %v1561_v1  ;;  %v1717_v37 = vsub.f32 %v52_v8, %v108_v36  ;;  %v119_v38 = vsub.f32 %v53_v27, %v108_v36  ;;  %v120_v39 = vsub.f32 %v54_v32, %v108_v36  ;;  %1269 = vmatprep.mubr.msk.f32.mxu1 %vm1564_vm5, %v1565_v20 }
  0xb9   :  { %1363 = vmatprep.subr.bf16.mxu1 %v1561_v1  ;;  %1379 = vmatprep.subr.bf16.mxu0 %v1562_v2  ;;  %v1758_v49 = vsub.f32 %v65_v46, %v130_v48  ;;  %v144_v60 = vsub.f32 %v66_v55, %v130_v48  ;;  %v142_v61 = vsub.f32 %v64_v14, %v130_v48 }
  0xba   :  { %237 = vmatprep.mubr.f32.mxu0 %v119_v38  ;;  %1270 = vmatmul.mubr.msk.f32.gmra.mrb[2].mxu1 %vm154_vm6, %v120_v39  ;;  %v344_v45 = vmul.f32 %v120_v39, %v120_v39  ;;  %v343_v51 = vmul.f32 %v119_v38, %v119_v38  ;;  %v342_v52 = vmul.f32 %v1717_v37, %v1717_v37  ;;  %v153_v38 = vld [vmem:[#allocation2 + $0x10] sm:$0x3f] }
  0xbb   :  { %1364 = vmatpush3.bf16.msra.mxu1 %v1561_v1  ;;  %238 = vmatmul.mubr.f32.gmra.mrb[2].mxu0 %v1717_v37  ;;  %v135_v58 = vpop.permute.xlu0 %134  ;;  %v140_v4 = vpop.permute.xlu1 %139  ;;  %v705_v11 = vmul.f32 %v1758_v49, %v1758_v49  ;;  %v706_v12 = vmul.f32 %v144_v60, %v144_v60 }
  0xbc   :  { %1380 = vmatpush3.bf16.msra.mxu0 %v1561_v1  ;;  %1272 = vmatprep.mubr.msk.f32.mxu1 %vm1564_vm5, %v1565_v20  ;;  %v146_v63 = vsub.f32 %v68_v57, %v135_v58  ;;  %v147_v5 = vsub.f32 %v69_v59, %v135_v58  ;;  %v145_v7 = vsub.f32 %v67_v13, %v135_v58 }
  0xbd   :  { %1365 = vmatprep.subr.bf16.mxu1 %v1561_v1  ;;  %242 = vmatprep.mubr.f32.mxu0 %v122_v40  ;;  %v149_v8 = vsub.f32 %v71_v0, %v140_v4  ;;  %v150_v9 = vsub.f32 %v72_v6, %v140_v4  ;;  %v148_v10 = vsub.f32 %v70_v15, %v140_v4  ;;  %v338_v0 = vld [vmem:[#allocation3 + $0x10] sm:$0x3f] }
  0xbe   :  { %1273 = vmatmul.mubr.msk.f32.gmra.mrb[4].mxu1 %vm154_vm6, %v123_v41  ;;  %1381 = vmatprep.subr.bf16.mxu0 %v1562_v2  ;;  %v704_v13 = vmul.f32 %v142_v61, %v142_v61  ;;  %v708_v14 = vmul.f32 %v146_v63, %v146_v63  ;;  %v707_v15 = vmul.f32 %v145_v7, %v145_v7 }
  0xbf   :  { %1366 = vmatpush3.bf16.msra.mxu1 %v1561_v1  ;;  %243 = vmatmul.mubr.f32.gmra.mrb[4].mxu0 %v1727_v42  ;;  %v712_v3 = vmul.f32 %v150_v9, %v150_v9  ;;  %v711_v16 = vmul.f32 %v149_v8, %v149_v8  ;;  %v710_v17 = vmul.f32 %v148_v10, %v148_v10 }
  0xc0   :  { %421 = vmatprep.mubr.f32.mxu1 %v340_v43  ;;  %1383 = vmatpush3.bf16.msk.msra.mxu0 %vm1618_vm2, %v1561_v1 }
  0xc1   :  { %1367 = vmatprep.subr.bf16.mxu1 %v1561_v1  ;;  %1287 = vmatprep.mubr.msk.f32.mxu0 %vm1564_vm5, %v1565_v20 }
  0xc2   :  { %1384 = vmatprep.subr.bf16.mxu0 %v1561_v1 }
  0xc3   :  { %1368 = vmatpush3.bf16.msra.mxu1 %v1561_v1  ;;  %1288 = vmatmul.mubr.msk.f32.vlgmr.msra.gmra.mrb[6].mxu0 %vm154_vm6, %v341_v44 }
  0xc4   :  { %1385 = vmatpush3.bf16.msra.mxu0 %v1561_v1  ;;  %1369 = vmatprep.subr.bf16.mxu1 %v1561_v1 }
  0xc5   :  { %1290 = vmatprep.mubr.msk.f32.mxu0 %vm1564_vm5, %v1565_v20  ;;  %1386 = vmatprep.subr.bf16.mxu0 %v1561_v1 }
  0xc7   :  { %1370 = vmatpush3.bf16.msra.mxu1 %v1561_v1  ;;  %1291 = vmatmul.mubr.msk.f32.gmra.mrb[8].mxu0 %vm154_vm6, %v344_v45 }
  0xc8   :  { %1387 = vmatpush3.bf16.msra.mxu0 %v1561_v1  ;;  %1371 = vmatprep.subr.bf16.mxu1 %v1561_v1 }
  0xc9   :  { %1388 = vmatprep.subr.bf16.mxu0 %v1561_v1  ;;  %1293 = vmatprep.mubr.msk.f32.mxu0 %vm1564_vm5, %v1565_v20 }
  0xcb   :  { %1372 = vmatpush3.bf16.msra.mxu1 %v1561_v1  ;;  %1294 = vmatmul.mubr.msk.f32.gmra.mrb[10].mxu0 %vm154_vm6, %v347_v47 }
  0xcc   :  { %1389 = vmatpush3.bf16.msra.mxu0 %v1561_v1  ;;  %1373 = vmatprep.subr.bf16.mxu1 %v1561_v1 }
  0xcd   :  { %1390 = vmatprep.subr.bf16.mxu0 %v1561_v1  ;;  %599 = vmatprep.mubr.f32.mxu0 %v1758_v49 }
  0xcf   :  { %1374 = vmatpush3.bf16.msra.mxu1 %v1561_v1 }
  0xd0   :  { %1391 = vmatpush3.bf16.msra.mxu0 %v1561_v1  ;;  %1375 = vmatprep.subr.bf16.mxu1 %v1561_v1 }
  0xd1   :  { %1392 = vmatprep.subr.bf16.mxu0 %v1561_v1 }
  0xd3   :  { %1376 = vmatpush3.bf16.msra.mxu1 %v1561_v1 }
  0xd4   :  { %1393 = vmatpush3.bf16.msra.mxu0 %v1561_v1  ;;  %1400 = vmatprep.subr.bf16.mxu1 %v1562_v2 }
  0xd5   :  { %1394 = vmatprep.subr.bf16.mxu0 %v1561_v1 }
  0xd6   :  { %422 = vmatmul.mubr.f32.vlgmr.msra.gmra.mrb[6].mxu1 %v339_v50  ;;  %v336_v50 = vld [vmem:[#allocation3] sm:$0xff] }
  0xd7   :  { %426 = vmatprep.mubr.f32.mxu1 %v343_v51  ;;  %1401 = vmatpush3.bf16.msra.mxu1 %v1561_v1 }
  0xd8   :  { %1395 = vmatpush3.bf16.msra.mxu0 %v1561_v1  ;;  %1402 = vmatprep.subr.bf16.mxu1 %v1562_v2 }
  0xd9   :  { %1396 = vmatprep.subr.bf16.mxu0 %v1561_v1 }
  0xda   :  { %427 = vmatmul.mubr.f32.gmra.mrb[8].mxu1 %v342_v52 }
  0xdb   :  { %431 = vmatprep.mubr.f32.mxu1 %v346_v53  ;;  %1403 = vmatpush3.bf16.msra.mxu1 %v1561_v1 }
  0xdc   :  { %1397 = vmatpush3.bf16.msra.mxu0 %v1561_v1  ;;  %1404 = vmatprep.subr.bf16.mxu1 %v1562_v2 }
  0xdd   :  { %1398 = vmatprep.subr.bf16.mxu0 %v1561_v1 }
  0xde   :  { %432 = vmatmul.mubr.f32.gmra.mrb[10].mxu1 %v345_v56  ;;  %v337_v56 = vld [vmem:[#allocation3 + $0x8] sm:$0xff] }
  0xdf   :  { %1406 = vmatpush3.bf16.msk.msra.mxu1 %vm1618_vm2, %v1561_v1  ;;  %1308 = vmatprep.mubr.msk.f32.mxu1 %vm1564_vm5, %v1565_v20 }
  0xe0   :  { %1399 = vmatpush3.bf16.msra.mxu0 %v1561_v1  ;;  %1407 = vmatprep.subr.bf16.mxu1 %v1561_v1 }
  0xe1   :  { %1423 = vmatprep.subr.bf16.mxu0 %v1562_v2 }
  0xe2   :  { %1309 = vmatmul.mubr.msk.f32.vlgmr.msra.gmra.mrb[12].mxu1 %vm154_vm6, %v144_v60 }
  0xe3   :  { %600 = vmatmul.mubr.f32.vlgmr.msra.gmra.mrb[12].mxu0 %v142_v61  ;;  %1408 = vmatpush3.bf16.msra.mxu1 %v1561_v1 }
  0xe4   :  { %604 = vmatprep.mubr.f32.mxu0 %v146_v63  ;;  %1424 = vmatpush3.bf16.msra.mxu0 %v1561_v1 }
  0xe5   :  { %1311 = vmatprep.mubr.msk.f32.mxu1 %vm1564_vm5, %v1565_v20  ;;  %1409 = vmatprep.subr.bf16.mxu1 %v1561_v1 }
  0xe6   :  { %1312 = vmatmul.mubr.msk.f32.gmra.mrb[14].mxu1 %vm154_vm6, %v147_v5  ;;  %1425 = vmatprep.subr.bf16.mxu0 %v1562_v2 }
  0xe7   :  { %605 = vmatmul.mubr.f32.gmra.mrb[14].mxu0 %v145_v7  ;;  %1410 = vmatpush3.bf16.msra.mxu1 %v1561_v1 }
  0xe8   :  { %609 = vmatprep.mubr.f32.mxu0 %v149_v8  ;;  %1426 = vmatpush3.bf16.msra.mxu0 %v1561_v1 }
  0xe9   :  { %1314 = vmatprep.mubr.msk.f32.mxu1 %vm1564_vm5, %v1565_v20  ;;  %1411 = vmatprep.subr.bf16.mxu1 %v1561_v1 }
  0xea   :  { %1315 = vmatmul.mubr.msk.f32.gmra.mrb[16].mxu1 %vm154_vm6, %v150_v9  ;;  %1427 = vmatprep.subr.bf16.mxu0 %v1562_v2  ;;  %v709_v2 = vmul.f32 %v147_v5, %v147_v5 }
  0xeb   :  { %610 = vmatmul.mubr.f32.gmra.mrb[16].mxu0 %v148_v10  ;;  %1412 = vmatpush3.bf16.msra.mxu1 %v1561_v1 }
  0xec   :  { %786 = vmatprep.mubr.f32.mxu1 %v705_v11  ;;  %1429 = vmatpush3.bf16.msk.msra.mxu0 %vm1618_vm2, %v1561_v1 }
  0xed   :  { %1413 = vmatprep.subr.bf16.mxu1 %v1561_v1  ;;  %1329 = vmatprep.mubr.msk.f32.mxu0 %vm1564_vm5, %v1565_v20 }
  0xef   :  { %1414 = vmatpush3.bf16.msra.mxu1 %v1561_v1  ;;  %1330 = vmatmul.mubr.msk.f32.vlgmr.msra.gmra.mrb[18].mxu0 %vm154_vm6, %v706_v12 }
  0xf0   :  { %1415 = vmatprep.subr.bf16.mxu1 %v1561_v1  ;;  %1332 = vmatprep.mubr.msk.f32.mxu0 %vm1564_vm5, %v1565_v20 }
  0xf3   :  { %1416 = vmatpush3.bf16.msra.mxu1 %v1561_v1  ;;  %1333 = vmatmul.mubr.msk.f32.gmra.mrb[20].mxu0 %vm154_vm6, %v709_v2 }
  0xf4   :  { %1417 = vmatprep.subr.bf16.mxu1 %v1561_v1  ;;  %1335 = vmatprep.mubr.msk.f32.mxu0 %vm1564_vm5, %v1565_v20 }
  0xf7   :  { %1418 = vmatpush3.bf16.msra.mxu1 %v1561_v1  ;;  %1336 = vmatmul.mubr.msk.f32.gmra.mrb[22].mxu0 %vm154_vm6, %v712_v3 }
  0xf8   :  { %1419 = vmatprep.subr.bf16.mxu1 %v1561_v1 }
  0xfb   :  { %1420 = vmatpush3.bf16.msra.mxu1 %v1561_v1 }
  0xfc   :  { %1421 = vmatprep.subr.bf16.mxu1 %v1561_v1 }
  0xff   :  { %1422 = vmatpush3.bf16.msra.mxu1 %v1561_v1 }
 0x102   :  { %787 = vmatmul.mubr.f32.vlgmr.msra.gmra.mrb[18].mxu1 %v704_v13 }
 0x103   :  { %791 = vmatprep.mubr.f32.mxu1 %v708_v14  ;;  %v523_v14 = vld [vmem:[#allocation5] sm:$0xff] }
 0x106   :  { %792 = vmatmul.mubr.f32.gmra.mrb[20].mxu1 %v707_v15 }
 0x107   :  { %796 = vmatprep.mubr.f32.mxu1 %v711_v16 }
 0x10a   :  { %797 = vmatmul.mubr.f32.gmra.mrb[22].mxu1 %v710_v17 }
 0x189   :  { %v314_v18 = vpop.f32.mrb[0].mxu1 }
 0x18a   :  { %v1086_v19 = vpop.f32.mrb[0].mxu0  ;;  %v1268_v20 = vpop.f32.mrb[1].mxu1 }
 0x18b   :  { %v1087_v21 = vpop.f32.mrb[1].mxu0 }
 0x18c   :  { %v1088_v22 = vadd.f32 %v1087_v21, %v1086_v19 }
 0x18d   :  { %v319_v24 = vpop.f32.mrb[2].mxu1 }
 0x18e   :  { %v315_v25 = vadd.f32 %v1088_v22, %v314_v18  ;;  %v1089_v26 = vpop.f32.mrb[2].mxu0  ;;  %v1271_v1 = vpop.f32.mrb[3].mxu1 }
 0x18f   :  { %v1090_v27 = vpop.f32.mrb[3].mxu0  ;;  %v524_v1 = vld [vmem:[#allocation5 + $0x8] sm:$0xff] }
 0x190   :  { %v328_v28 = vadd.f32 %v315_v25, %v151_v23  ;;  %v1091_v29 = vadd.f32 %v1090_v27, %v1089_v26 }
 0x191   :  { %v324_v31 = vpop.f32.mrb[4].mxu1 }
 0x192   :  { %332 = vst.msk [vmem:[#allocation2] sm:$0xff] %vm77_vm3, %v328_v28  ;;  %v320_v32 = vadd.f32 %v1091_v29, %v319_v24  ;;  %v1092_v33 = vpop.f32.mrb[4].mxu0  ;;  %v1274_v34 = vpop.f32.mrb[5].mxu1 }
 0x193   :  { %v1093_v35 = vpop.f32.mrb[5].mxu0 }
 0x194   :  { %v329_v36 = vadd.f32 %v320_v32, %v152_v30  ;;  %v1094_v37 = vadd.f32 %v1093_v35, %v1092_v33 }
 0x196   :  { %333 = vst.msk [vmem:[#allocation2 + $0x8] sm:$0xff] %vm77_vm3, %v329_v36  ;;  %v503_v39 = vpop.f32.mrb[6].mxu0  ;;  %v325_v40 = vadd.f32 %v1094_v37, %v324_v31 }
 0x197   :  { %v1289_v41 = vpop.f32.mrb[7].mxu0 }
 0x198   :  { %v330_v42 = vadd.f32 %v325_v40, %v153_v38 }
 0x199   :  { %v894_v57 = vld [vmem:[#allocation2] sm:$0xff] }
 0x19a   :  { %v508_v43 = vpop.f32.mrb[8].mxu0  ;;  %335 = vst.msk [vmem:[#allocation2 + $0x10] sm:$0x3f] %vm80_vm4, %v330_v42  ;;  %v897_v63 = vmul.f32 %v894_v57, %v894_v57 }
 0x19b   :  { %v1292_v44 = vpop.f32.mrb[9].mxu0 }
 0x19c   :  { %v900_v12 = vmul.f32 0.0033333334, %v897_v63 }
 0x19d   :  { %v895_v4 = vld [vmem:[#allocation2 + $0x8] sm:$0xff] }
 0x19e   :  { %v513_v45 = vpop.f32.mrb[10].mxu0  ;;  %v898_v11 = vmul.f32 %v895_v4, %v895_v4 }
 0x19f   :  { %v1295_v46 = vpop.f32.mrb[11].mxu0 }
 0x1a0   :  { %v901_v22 = vmul.f32 0.0033333334, %v898_v11 }
 0x1a1   :  { %v896_v13 = vld [vmem:[#allocation2 + $0x10] sm:$0x3f] }
 0x1a2   :  { %v899_v21 = vmul.f32 %v896_v13, %v896_v13 }
 0x1a4   :  { %v902_v34 = vmul.f32 0.0033333334, %v899_v21 }
 0x1a9   :  { %v1136_v47 = vpop.f32.mrb[6].mxu1 }
 0x1aa   :  { %v1137_v48 = vpop.f32.mrb[7].mxu1 }
 0x1ab   :  { %v1138_v49 = vadd.f32 %v1137_v48, %v1136_v47 }
 0x1ad   :  { %v504_v51 = vadd.f32 %v1138_v49, %v503_v39  ;;  %v1139_v52 = vpop.f32.mrb[8].mxu1  ;;  %v525_v39 = vld [vmem:[#allocation5 + $0x10] sm:$0x3f] }
 0x1ae   :  { %v1140_v53 = vpop.f32.mrb[9].mxu1 }
 0x1af   :  { %v517_v54 = vadd.f32 %v504_v51, %v336_v50  ;;  %v1141_v55 = vadd.f32 %v1140_v53, %v1139_v52 }
 0x1b1   :  { %520 = vst.msk [vmem:[#allocation3] sm:$0xff] %vm77_vm3, %v517_v54  ;;  %v509_v58 = vadd.f32 %v1141_v55, %v508_v43  ;;  %v1142_v59 = vpop.f32.mrb[10].mxu1 }
 0x1b2   :  { %v1143_v60 = vpop.f32.mrb[11].mxu1 }
 0x1b3   :  { %v518_v61 = vadd.f32 %v509_v58, %v337_v56  ;;  %v1144_v62 = vadd.f32 %v1143_v60, %v1142_v59 }
 0x1b5   :  { %521 = vst.msk [vmem:[#allocation3 + $0x8] sm:$0xff] %vm77_vm3, %v518_v61  ;;  %v514_v5 = vadd.f32 %v1144_v62, %v513_v45  ;;  %v681_v6 = vpop.f32.mrb[12].mxu1 }
 0x1b6   :  { %v1186_v7 = vpop.f32.mrb[12].mxu0  ;;  %v1310_v8 = vpop.f32.mrb[13].mxu1 }
 0x1b7   :  { %v519_v9 = vadd.f32 %v514_v5, %v338_v0  ;;  %v1187_v10 = vpop.f32.mrb[13].mxu0 }
 0x1b8   :  { %v1188_v2 = vadd.f32 %v1187_v10, %v1186_v7  ;;  %v891_v3 = vld [vmem:[#allocation3] sm:$0xff] }
 0x1b9   :  { %522 = vst.msk [vmem:[#allocation3 + $0x10] sm:$0x3f] %vm80_vm4, %v519_v9  ;;  %v686_v15 = vpop.f32.mrb[14].mxu1  ;;  %v903_v16 = vsub.f32 %v891_v3, %v900_v12  ;;  %v701_v3 = vld [vmem:[#allocation6] sm:$0xff] }
 0x1ba   :  { %v682_v17 = vadd.f32 %v1188_v2, %v681_v6  ;;  %v1189_v18 = vpop.f32.mrb[14].mxu0  ;;  %v1313_v19 = vpop.f32.mrb[15].mxu1 }
 0x1bb   :  { %v1190_v20 = vpop.f32.mrb[15].mxu0  ;;  %v906_v23 = vmul.f32 0.0033444816, %v903_v16 }
 0x1bc   :  { %v695_v24 = vadd.f32 %v682_v17, %v523_v14  ;;  %v1191_v25 = vadd.f32 %v1190_v20, %v1189_v18  ;;  %v892_v26 = vld [vmem:[#allocation3 + $0x8] sm:$0xff]  ;;  %v702_v18 = vld [vmem:[#allocation6 + $0x8] sm:$0xff] }
 0x1bd   :  { %v691_v27 = vpop.f32.mrb[16].mxu1  ;;  %v904_v28 = vsub.f32 %v892_v26, %v901_v22  ;;  %v927_v29 = vmax.f32 %v906_v23, 0.0  ;;  %v703_v26 = vld [vmem:[#allocation6 + $0x10] sm:$0x3f] }
 0x1be   :  { %698 = vst.msk [vmem:[#allocation5] sm:$0xff] %vm77_vm3, %v695_v24  ;;  %v687_v30 = vadd.f32 %v1191_v25, %v686_v15  ;;  %v1192_v31 = vpop.f32.mrb[16].mxu0  ;;  %v1316_v32 = vpop.f32.mrb[17].mxu1 }
 0x1bf   :  { %v1193_v33 = vpop.f32.mrb[17].mxu0  ;;  %v907_v35 = vmul.f32 0.0033444816, %v904_v28  ;;  %1448 = vrsqrt.f32 %v927_v29  ;;  %vm932_vm7 = vcmp.eq.f32.partialorder %v927_v29, inf  ;;  %v935_v57 = vand.u32 2147483648, %v927_v29 }
 0x1c0   :  { %v696_v36 = vadd.f32 %v687_v30, %v524_v1  ;;  %v1194_v37 = vadd.f32 %v1193_v33, %v1192_v31  ;;  %v893_v38 = vld [vmem:[#allocation3 + $0x10] sm:$0x3f]  ;;  %vm934_vm9 = vcmp.eq.f32.partialorder %v927_v29, 0.0 }
 0x1c1   :  { %v905_v40 = vsub.f32 %v893_v38, %v902_v34  ;;  %v928_v41 = vmax.f32 %v907_v35, 0.0 }
 0x1c2   :  { %699 = vst.msk [vmem:[#allocation5 + $0x8] sm:$0xff] %vm77_vm3, %v696_v36  ;;  %v692_v42 = vadd.f32 %v1194_v37, %v691_v27  ;;  %v868_v43 = vpop.f32.mrb[18].mxu0 }
 0x1c3   :  { %v1331_v44 = vpop.f32.mrb[19].mxu0  ;;  %v908_v45 = vmul.f32 0.0033444816, %v905_v40  ;;  %1450 = vrsqrt.f32 %v928_v41  ;;  %vm939_vm8 = vcmp.eq.f32.partialorder %v928_v41, inf  ;;  %v942_v58 = vand.u32 2147483648, %v928_v41 }
 0x1c4   :  { %v697_v46 = vadd.f32 %v692_v42, %v525_v39  ;;  %vm941_vm10 = vcmp.eq.f32.partialorder %v928_v41, 0.0 }
 0x1c5   :  { %v929_v47 = vmax.f32 %v908_v45, 0.0  ;;  %v912_v19 = vld [vmem:[#allocation5] sm:$0xff] }
 0x1c6   :  { %700 = vst.msk [vmem:[#allocation5 + $0x10] sm:$0x3f] %vm80_vm4, %v697_v46  ;;  %v873_v48 = vpop.f32.mrb[20].mxu0  ;;  %v915_v25 = vmul.f32 %v912_v19, %v912_v19 }
 0x1c7   :  { %v1334_v49 = vpop.f32.mrb[21].mxu0  ;;  %1452 = vrsqrt.f32 %v929_v47  ;;  %vm946_vm11 = vcmp.eq.f32.partialorder %v929_v47, inf  ;;  %v949_v4 = vand.u32 2147483648, %v929_v47  ;;  %vm948_vm12 = vcmp.eq.f32.partialorder %v929_v47, 0.0 }
 0x1c8   :  { %v918_v30 = vmul.f32 0.0033333334, %v915_v25 }
 0x1c9   :  { %v1449_v50 = vpop.eup %1448  ;;  %v913_v1 = vld [vmem:[#allocation5 + $0x8] sm:$0xff] }
 0x1ca   :  { %v878_v51 = vpop.f32.mrb[22].mxu0  ;;  %v931_v52 = vmul.f32 %v1449_v50, %v927_v29 }
 0x1cb   :  { %v1337_v53 = vpop.f32.mrb[23].mxu0 }
 0x1cc   :  { %v933_v55 = vsel %vm932_vm7, %v927_v29, %v931_v52  ;;  %v916_v29 = vmul.f32 %v913_v1, %v913_v1 }
 0x1cd   :  { %v1451_v54 = vpop.eup %1450  ;;  %v936_v61 = vsel %vm934_vm9, %v935_v57, %v933_v55  ;;  %v914_v32 = vld [vmem:[#allocation5 + $0x10] sm:$0x3f] }
 0x1ce   :  { %v938_v56 = vmul.f32 %v1451_v54, %v928_v41  ;;  %v975_v6 = vsel %vm77_vm3, %v936_v61, 0.0  ;;  %v917_v34 = vmul.f32 %v914_v32, %v914_v32  ;;  %v919_v35 = vmul.f32 0.0033333334, %v916_v29 }
 0x1d0   :  { %v940_v59 = vsel %vm939_vm8, %v928_v41, %v938_v56  ;;  %v920_v40 = vmul.f32 0.0033333334, %v917_v34 }
 0x1d1   :  { %v1453_v60 = vpop.eup %1452  ;;  %v943_v62 = vsel %vm941_vm10, %v942_v58, %v940_v59 }
 0x1d2   :  { %v945_v63 = vmul.f32 %v1453_v60, %v929_v47  ;;  %v976_v0 = vsel %vm77_vm3, %v943_v62, 0.0 }
 0x1d3   :  { %v977_v9 = vadd.f32 %v976_v0, %v975_v6 }
 0x1d4   :  { %v947_v5 = vsel %vm946_vm11, %v929_v47, %v945_v63 }
 0x1d5   :  { %v1236_v7 = vpop.f32.mrb[18].mxu1  ;;  %v950_v8 = vsel %vm948_vm12, %v949_v4, %v947_v5 }
 0x1d6   :  { %v1237_v10 = vpop.f32.mrb[19].mxu1  ;;  %v978_v11 = vsel %vm80_vm4, %v950_v8, 0.0 }
 0x1d7   :  { %v1238_v12 = vadd.f32 %v1237_v10, %v1236_v7  ;;  %v979_v2 = vadd.f32 %v978_v11, %v977_v9 }
 0x1d9   :  { %v869_v13 = vadd.f32 %v1238_v12, %v868_v43  ;;  %980 = vadd.xlane.f32.xlu0 %v979_v2  ;;  %v1239_v14 = vpop.f32.mrb[20].mxu1 }
 0x1da   :  { %v1240_v15 = vpop.f32.mrb[21].mxu1 }
 0x1db   :  { %v882_v16 = vadd.f32 %v869_v13, %v701_v3  ;;  %v1241_v17 = vadd.f32 %v1240_v15, %v1239_v14 }
 0x1dd   :  { %885 = vst.msk [vmem:[#allocation6] sm:$0xff] %vm77_vm3, %v882_v16  ;;  %v874_v20 = vadd.f32 %v1241_v17, %v873_v48  ;;  %v1242_v21 = vpop.f32.mrb[22].mxu1 }
 0x1de   :  { %v1243_v22 = vpop.f32.mrb[23].mxu1 }
 0x1df   :  { %v883_v23 = vadd.f32 %v874_v20, %v702_v18  ;;  %v1244_v24 = vadd.f32 %v1243_v22, %v1242_v21 }
 0x1e1   :  { %886 = vst.msk [vmem:[#allocation6 + $0x8] sm:$0xff] %vm77_vm3, %v883_v23  ;;  %v879_v27 = vadd.f32 %v1244_v24, %v878_v51 }
 0x1e3   :  { %v884_v28 = vadd.f32 %v879_v27, %v703_v26 }
 0x1e4   :  { %v909_v31 = vld [vmem:[#allocation6] sm:$0xff] }
 0x1e5   :  { %887 = vst.msk [vmem:[#allocation6 + $0x10] sm:$0x3f] %vm80_vm4, %v884_v28  ;;  %v921_v33 = vsub.f32 %v909_v31, %v918_v30 }
 0x1e7   :  { %v924_v36 = vmul.f32 0.0033444816, %v921_v33 }
 0x1e8   :  { %v910_v37 = vld [vmem:[#allocation6 + $0x8] sm:$0xff] }
 0x1e9   :  { %v922_v38 = vsub.f32 %v910_v37, %v919_v35  ;;  %v951_v39 = vmax.f32 %v924_v36, 0.0 }
 0x1eb   :  { %v925_v41 = vmul.f32 0.0033444816, %v922_v38  ;;  %1454 = vrsqrt.f32 %v951_v39  ;;  %vm956_vm13 = vcmp.eq.f32.partialorder %v951_v39, inf  ;;  %v959_v52 = vand.u32 2147483648, %v951_v39 }
 0x1ec   :  { %v911_v42 = vld [vmem:[#allocation6 + $0x10] sm:$0x3f]  ;;  %vm958_vm15 = vcmp.eq.f32.partialorder %v951_v39, 0.0 }
 0x1ed   :  { %v923_v43 = vsub.f32 %v911_v42, %v920_v40  ;;  %v952_v44 = vmax.f32 %v925_v41, 0.0 }
 0x1ef   :  { %v926_v45 = vmul.f32 0.0033444816, %v923_v43  ;;  %1456 = vrsqrt.f32 %v952_v44  ;;  %vm963_vm14 = vcmp.eq.f32.partialorder %v952_v44, inf  ;;  %v966_v53 = vand.u32 2147483648, %v952_v44 }
 0x1f0   :  { %vm965_vm0 = vcmp.eq.f32.partialorder %v952_v44, 0.0 }
 0x1f1   :  { %v953_v46 = vmax.f32 %v926_v45, 0.0 }
 0x1f3   :  { %1458 = vrsqrt.f32 %v953_v46  ;;  %vm970_vm1 = vcmp.eq.f32.partialorder %v953_v46, inf  ;;  %v973_v60 = vand.u32 2147483648, %v953_v46  ;;  %vm972_vm2 = vcmp.eq.f32.partialorder %v953_v46, 0.0 }
 0x1f5   :  { %v1455_v47 = vpop.eup %1454 }
 0x1f6   :  { %v955_v48 = vmul.f32 %v1455_v47, %v951_v39 }
 0x1f8   :  { %v957_v50 = vsel %vm956_vm13, %v951_v39, %v955_v48 }
 0x1f9   :  { %v1457_v49 = vpop.eup %1456  ;;  %v960_v56 = vsel %vm958_vm15, %v959_v52, %v957_v50 }
 0x1fa   :  { %v962_v51 = vmul.f32 %v1457_v49, %v952_v44  ;;  %v992_v62 = vsel %vm77_vm3, %v960_v56, 0.0 }
 0x1fc   :  { %v964_v54 = vsel %vm963_vm14, %v952_v44, %v962_v51 }
 0x1fd   :  { %v1459_v55 = vpop.eup %1458  ;;  %v967_v57 = vsel %vm965_vm0, %v966_v53, %v964_v54 }
 0x1fe   :  { %v969_v58 = vmul.f32 %v1459_v55, %v953_v46  ;;  %v993_v59 = vsel %vm77_vm3, %v967_v57, 0.0  ;;  %vm990_vm3 = vcmask 0  }
 0x1ff   :  { %v994_v0 = vadd.f32 %v993_v59, %v992_v62 }
 0x200   :  { %v971_v61 = vsel %vm970_vm1, %v953_v46, %v969_v58 }
 0x201   :  { %v974_v63 = vsel %vm972_vm2, %v973_v60, %v971_v61 }
 0x202   :  { %v995_v4 = vsel %vm80_vm4, %v974_v63, 0.0 }
 0x203   :  { %v996_v5 = vadd.f32 %v995_v4, %v994_v0 }
 0x205   :  { %997 = vadd.xlane.f32.xlu1 %v996_v5 }
 0x266   :  { %v981_v6 = vpop.xlane.xlu0 %980 }
 0x267   :  { %v982_v7 = vrot.slane %v981_v6, 4 }
 0x269   :  { %v983_v8 = vadd.f32 %v982_v7, %v981_v6 }
 0x26b   :  { %v984_v9 = vrot.slane %v983_v8, 2 }
 0x26d   :  { %v985_v10 = vadd.f32 %v984_v9, %v983_v8 }
 0x26f   :  { %v986_v11 = vrot.slane %v985_v10, 1 }
 0x271   :  { %v987_v12 = vadd.f32 %v986_v11, %v985_v10 }
 0x273   :  { %1430 = vpush %v987_v12 }
 0x292   :  { %v998_v2 = vpop.xlane.xlu1 %997 }
 0x293   :  { %v999_v3 = vrot.slane %v998_v2, 4 }
 0x295   :  { %v1000_v13 = vadd.f32 %v999_v3, %v998_v2 }
 0x297   :  { %v1001_v14 = vrot.slane %v1000_v13, 2 }
 0x299   :  { %v1002_v15 = vadd.f32 %v1001_v14, %v1000_v13 }
 0x29b   :  { %v1003_v16 = vrot.slane %v1002_v15, 1 }
 0x29d   :  { %v1004_v17 = vadd.f32 %v1003_v16, %v1002_v15 }
 0x29f   :  { %1432 = vpush %v1004_v17 }
 0x2a4   :  { %s1431_s11 = spop %1430 }
 0x2a5   :  { %v989_v18 = vstv %s1431_s11 }
 0x2a6   :  { %991 = vst.msk [vmem:[#allocation13] sm:$0x1] %vm990_vm3, %v989_v18 }
 0x2a7   :  { %1515 = shalt.err (!%p1512_p6)
}
 0x2a8   :  { %s1516_s16 = scalar_lea.hbm %s1892_s2, 16 }
 0x2a9   :  { %p1517_p7 = scmp.ne.s32.totalorder %s1892_s2, %s1516_s16  ;;  %p1520_p8 = scmp.lt.u32.totalorder %s1516_s16, %s1892_s2 }
 0x2ab   :  { %p1522_p9 = pnand %p1520_p8, %p1517_p7 }
 0x2ad   :  { %1525 = shalt.err (!%p1522_p9)
}
 0x2ae   :  { %1017 = dma.vmem_to_hbm [thread:$0]  %s1015_s10, 16, %s1892_s2, [#allocation10]  }
 0x2af   :  { %s1567_s23 = smov [#allocation14]  }
 0x2b0   :  { %s1024_s24 = sshll.u32 %s1567_s23, 4  ;;  %s1025_s24 = int_to_ptr.vmem [resolvable:$true] %s1024_s24 }
 0x2b1   :  { %s1526_s26 = scalar_lea.vmem %s1025_s24, 16  ;;  %s1530_s27 = scalar_lea.vmem %s1025_s24, 32 }
 0x2b2   :  { %p1527_p10 = scmp.ne.s32.totalorder %s1025_s24, %s1526_s26  ;;  %p1531_p11 = scmp.lt.s32.totalorder %s1025_s24, %s1025_s24 }
 0x2b3   :  { %p1532_p12 = scmp.lt.s32.totalorder %s1530_s27, %s1526_s26 }
 0x2b5   :  { %p1533_p13 = por %p1532_p12, %p1531_p11 }
 0x2b7   :  { %p1534_p0 = pnand %p1533_p13, %p1527_p10 }
 0x2d0   :  { %s1433_s25 = spop %1432 }
 0x2d1   :  { %v1006_v19 = vstv %s1433_s25 }
 0x2d2   :  { %1007 = vst.msk [vmem:[#allocation14] sm:$0x1] %vm990_vm3, %v1006_v19 }
 0x2d3   :  { %1537 = shalt.err (!%p1534_p0)
}
 0x2d4   :  { %s1538_s30 = scalar_lea.hbm %s1893_s3, 16 }
 0x2d5   :  { %p1539_p1 = scmp.ne.s32.totalorder %s1893_s3, %s1538_s30  ;;  %p1542_p2 = scmp.lt.u32.totalorder %s1538_s30, %s1893_s3 }
 0x2d7   :  { %p1544_p3 = pnand %p1542_p2, %p1539_p1 }
 0x2d9   :  { %1547 = shalt.err (!%p1544_p3)
}
 0x2da   :  { %1027 = dma.vmem_to_hbm [thread:$0]  %s1025_s24, 16, %s1893_s3, [#allocation15]  }
 0x2db   :  { %1552 = dma.done.wait [#allocation10], 16  }
 0x2dc   :  { %1553 = vsyncadd [#allocation10], 4294967280 }
 0x2dd   :  { %1554 = dma.done.wait [#allocation15], 16  }
 0x2de   :  { %1555 = vsyncadd [#allocation15], 4294967280 }
 0x2df   :  { %1034 = vsyncpa [#allocation9], 1 }
 0x2e0   :  { %1035 = vsyncpa [#allocation12], 1 }
 0x2e1   :  { %1036 = vsyncpa [#allocation10], 1 }
 0x2e2   :  { %1037 = vsyncpa [#allocation15], 1 }

</bundles_post_ra>
